<compile_context>
chip_gen: v6e
topology: v6e:2x2x1
jax: 0.10.0
libtpu: 0.0.40
codegen_flags: <defaults>
</compile_context>

<pallas_src>
import jax
import jax.numpy as jnp
from jax.experimental import pallas as pl
from jax.experimental.pallas import tpu as pltpu


def _features_loss_kernel(margin_ref, xi_ref, xj_ref, li_ref, lj_ref,
                          sqi_ref, sqj_ref, sum1_ref, sum2_ref,
                          acc1_ref, acc2_ref):
    i = pl.program_id(0)
    j = pl.program_id(1)

    @pl.when((i == 0) & (j == 0))
    def _init():
        acc1_ref[...] = jnp.zeros_like(acc1_ref)
        acc2_ref[...] = jnp.zeros_like(acc2_ref)

    # Symmetry: dist / hinge / label masks are symmetric, so only the upper
    # triangle of blocks is computed; off-diagonal blocks count twice.
    @pl.when(j >= i)
    def _compute():
        # gram[r, c] = <x_i[r], x_j[c]>; contract last dims on the MXU, f32 acc.
        gram = jax.lax.dot_general(
            xi_ref[...], xj_ref[...], (((1,), (1,)), ((), ())),
            preferred_element_type=jnp.float32)                   # (TM, TN)

        dist = sqi_ref[...] + sqj_ref[...] - 2.0 * gram           # (TM, TN)
        dist = jnp.maximum(dist, 0.0)

        # Exact zeros on the global diagonal (reference has (x_i - x_i) == 0).
        tm, tn = dist.shape
        rows = i * tm + jax.lax.broadcasted_iota(jnp.int32, (tm, tn), 0)
        cols = j * tn + jax.lax.broadcasted_iota(jnp.int32, (tm, tn), 1)
        dist = jnp.where(rows == cols, 0.0, dist)

        li = li_ref[...]                                          # (TM, 1) int32
        lj = lj_ref[...]                                          # (1, TN) int32
        valid = (li >= 0) & (lj >= 0)           # padded rows carry label -1
        same = (li == lj) & valid
        diff = (li != lj) & valid

        margin = margin_ref[0]
        hinge = jnp.maximum(margin - dist, 0.0)

        # Off-diagonal blocks stand in for their mirrored (j, i) block too.
        w = jnp.where(j > i, 2.0, 1.0).astype(jnp.float32)
        acc1_ref[...] += w * jnp.where(same, dist, 0.0)
        acc2_ref[...] += w * jnp.where(diff, hinge, 0.0)

    @pl.when((i == pl.num_programs(0) - 1) & (j == pl.num_programs(1) - 1))
    def _finalize():
        # Single deferred cross-lane reduction for the whole grid.
        sum1_ref[...] = jnp.sum(acc1_ref[...], keepdims=True)
        sum2_ref[...] = jnp.sum(acc2_ref[...], keepdims=True)


def features_loss(outputs, labels, margin, *, tile=256):
    """outputs: (N, D) float array, labels: (N,) int array. Returns scalar f32."""
    n, d = outputs.shape

    lab = labels.astype(jnp.int32)
    lab = lab - jnp.min(lab)          # labels >= 0 so -1 can mark padded rows

    # Pair counts computed analytically outside the kernel (trivial in XLA).
    same_full = lab[:, None] == lab[None, :]
    zn1 = jnp.sum(same_full).astype(jnp.float32)
    zn2 = jnp.float32(n * n) - zn1

    # Tile size: a single block (rounded to a sublane multiple) for small N;
    # otherwise 256 — a multiple of both 128 (v5e MXU) and 256 (v6e/v7x MXU),
    # sized so double-buffered x tiles + (TM,TM) scratch fit v7x's VMEM budget.
    n8 = ((n + 7) // 8) * 8
    tm = n8 if n8 <= tile else tile
    n_pad = ((n + tm - 1) // tm) * tm
    nb = n_pad // tm

    x = outputs
    if n_pad != n:
        x = jnp.pad(x, ((0, n_pad - n), (0, 0)))
        lab = jnp.pad(lab, (0, n_pad - n), constant_values=-1)

    # Squared row norms in f32, passed as both a column and a row view so the
    # kernel never transposes and never extracts them from the Gram diagonal.
    sq = jnp.sum(jnp.square(x.astype(jnp.float32)), axis=1)
    sq_col = sq.reshape(n_pad, 1)
    sq_row = sq.reshape(1, n_pad)
    lab_col = lab.reshape(n_pad, 1)
    lab_row = lab.reshape(1, n_pad)
    marg = jnp.asarray(margin, dtype=jnp.float32).reshape(1)

    sum1, sum2 = pl.pallas_call(
        _features_loss_kernel,
        out_shape=(jax.ShapeDtypeStruct((1, 1), jnp.float32),
                   jax.ShapeDtypeStruct((1, 1), jnp.float32)),
        grid=(nb, nb),
        in_specs=[
            pl.BlockSpec(memory_space=pltpu.MemorySpace.SMEM),      # margin
            pl.BlockSpec((tm, d), lambda i, j: (i, 0)),             # x, i-view
            pl.BlockSpec((tm, d), lambda i, j: (j, 0)),             # x, j-view
            pl.BlockSpec((tm, 1), lambda i, j: (i, 0)),             # labels col
            pl.BlockSpec((1, tm), lambda i, j: (0, j)),             # labels row
            pl.BlockSpec((tm, 1), lambda i, j: (i, 0)),             # |x|^2 col
            pl.BlockSpec((1, tm), lambda i, j: (0, j)),             # |x|^2 row
        ],
        out_specs=(pl.BlockSpec((1, 1), lambda i, j: (0, 0)),
                   pl.BlockSpec((1, 1), lambda i, j: (0, 0))),
        scratch_shapes=[pltpu.VMEM((tm, tm), jnp.float32),
                        pltpu.VMEM((tm, tm), jnp.float32)],
        compiler_params=pltpu.CompilerParams(
            dimension_semantics=("arbitrary", "arbitrary"),
            vmem_limit_bytes=32 * 1024 * 1024),
    )(marg, x, x, lab_col, lab_row, sq_col, sq_row)

    return 0.5 * (sum1[0, 0] / zn1 + sum2[0, 0] / zn2)


def _reference_loss(outputs, labels, margin):
    # Pure-JAX mirror of the PyTorch double loop.
    diff = outputs[:, None, :] - outputs[None, :, :]
    d2 = jnp.sum(diff * diff, axis=-1)
    same = labels[:, None] == labels[None, :]
    sum1 = jnp.sum(jnp.where(same, d2, 0.0))
    zn1 = jnp.sum(same.astype(jnp.float32))
    hinge = jnp.maximum(margin - d2, 0.0)
    sum2 = jnp.sum(jnp.where(same, 0.0, hinge))
    zn2 = jnp.sum((~same).astype(jnp.float32))
    return 0.5 * (sum1 / zn1 + sum2 / zn2)


if __name__ == "__main__":
    key = jax.random.PRNGKey(0)
    margin = 2.0

    # Small case matching the module's typical batch scale (single-block path).
    n, d = 8, 32
    k1, k2 = jax.random.split(key)
    outputs = jax.random.normal(k1, (n, d), dtype=jnp.float32)
    labels = jnp.array([0, 1, 0, 1, 2, 2, 0, 1], dtype=jnp.int32)

    loss = jax.block_until_ready(features_loss(outputs, labels, margin))
    ref = _reference_loss(outputs, labels, margin)
    assert jnp.allclose(loss, ref, rtol=1e-3, atol=1e-3), (loss, ref)

    # Larger case exercising the tiled / padded / symmetric multi-block path.
    n2, d2 = 320, 32
    outputs2 = jax.random.normal(k2, (n2, d2), dtype=jnp.float32)
    labels2 = (jnp.arange(n2, dtype=jnp.int32) % 7)

    loss2 = jax.block_until_ready(features_loss(outputs2, labels2, margin))
    ref2 = _reference_loss(outputs2, labels2, margin)
    assert jnp.allclose(loss2, ref2, rtol=1e-3, atol=1e-3), (loss2, ref2)

    print("KERNEL_OK")
</pallas_src>

<mosaic_0001>
module attributes {stable_mosaic.version = 11 : i64} {
  func.func @_features_loss_kernel(%arg0: i32, %arg1: i32, %arg2: memref<1xf32, #tpu.memory_space<smem>>, %arg3: memref<8x32xf32, #tpu.memory_space<vmem>>, %arg4: memref<8x32xf32, #tpu.memory_space<vmem>>, %arg5: memref<8x1xi32, #tpu.memory_space<vmem>>, %arg6: memref<1x8xi32, #tpu.memory_space<vmem>>, %arg7: memref<8x1xf32, #tpu.memory_space<vmem>>, %arg8: memref<1x8xf32, #tpu.memory_space<vmem>>, %arg9: memref<1x1xf32, #tpu.memory_space<vmem>>, %arg10: memref<1x1xf32, #tpu.memory_space<vmem>>, %arg11: memref<8x8xf32, #tpu.memory_space<vmem>>, %arg12: memref<8x8xf32, #tpu.memory_space<vmem>>) attributes {dimension_semantics = [#tpu.dimension_semantics<arbitrary>, #tpu.dimension_semantics<arbitrary>], iteration_bounds = array<i64: 1, 1>, scalar_prefetch = 0 : i64, scratch_operands = 2 : i64, tpu.core_type = #tpu.core_type<tc>, window_params = [{transform_indices = @transform_0, window_bounds = array<i64: 1>}, {transform_indices = @transform_1, window_bounds = array<i64: 8, 32>}, {transform_indices = @transform_2, window_bounds = array<i64: 8, 32>}, {transform_indices = @transform_3, window_bounds = array<i64: 8, 1>}, {transform_indices = @transform_4, window_bounds = array<i64: 1, 8>}, {transform_indices = @transform_5, window_bounds = array<i64: 8, 1>}, {transform_indices = @transform_6, window_bounds = array<i64: 1, 8>}, {pipeline_mode = #tpu.pipeline_mode<synchronous>, transform_indices = @transform_7, window_bounds = array<i64: 1, 1>}, {pipeline_mode = #tpu.pipeline_mode<synchronous>, transform_indices = @transform_8, window_bounds = array<i64: 1, 1>}]} {
    %c0_i32 = arith.constant 0 : i32
    %0 = arith.cmpi eq, %arg0, %c0_i32 : i32
    %c0_i32_0 = arith.constant 0 : i32
    %1 = arith.cmpi eq, %arg1, %c0_i32_0 : i32
    %2 = arith.andi %0, %1 : i1
    %3 = arith.extui %2 : i1 to i32
    %c0_i32_1 = arith.constant 0 : i32
    %4 = arith.cmpi ne, %3, %c0_i32_1 : i32
    scf.if %4 {
      %cst = arith.constant 0.000000e+00 : f32
      %13 = vector.broadcast %cst : f32 to vector<8x8xf32>
      %c0 = arith.constant 0 : index
      %c0_6 = arith.constant 0 : index
      %14 = vector.load %arg11[%c0, %c0_6] : memref<8x8xf32, #tpu.memory_space<vmem>>, vector<8x8xf32>
      tpu.vector_store %arg11[%c0, %c0_6], %13 {strides = array<i32>} : memref<8x8xf32, #tpu.memory_space<vmem>>, vector<8x8xf32>,
      %cst_7 = arith.constant 0.000000e+00 : f32
      %15 = vector.broadcast %cst_7 : f32 to vector<8x8xf32>
      %c0_8 = arith.constant 0 : index
      %c0_9 = arith.constant 0 : index
      %16 = vector.load %arg12[%c0_8, %c0_9] : memref<8x8xf32, #tpu.memory_space<vmem>>, vector<8x8xf32>
      tpu.vector_store %arg12[%c0_8, %c0_9], %15 {strides = array<i32>} : memref<8x8xf32, #tpu.memory_space<vmem>>, vector<8x8xf32>,
    } else {
    }
    %5 = arith.cmpi sge, %arg1, %arg0 : i32
    %6 = arith.extui %5 : i1 to i32
    %c0_i32_2 = arith.constant 0 : i32
    %7 = arith.cmpi ne, %6, %c0_i32_2 : i32
    scf.if %7 {
      %c0 = arith.constant 0 : index
      %c0_6 = arith.constant 0 : index
      %13 = vector.load %arg3[%c0, %c0_6] : memref<8x32xf32, #tpu.memory_space<vmem>>, vector<8x32xf32>
      %c0_7 = arith.constant 0 : index
      %c0_8 = arith.constant 0 : index
      %14 = vector.load %arg4[%c0_7, %c0_8] : memref<8x32xf32, #tpu.memory_space<vmem>>, vector<8x32xf32>
      %cst = arith.constant dense<0.000000e+00> : vector<8x8xf32>
      %15 = tpu.matmul %13, %14, %cst {dimension_numbers = #tpu.dot_dimension_numbers<[1], [1], [0], [0], [0, 0, 1, 0], [], []>} : vector<8x32xf32>, vector<8x32xf32>, vector<8x8xf32> -> vector<8x8xf32>
      %c0_9 = arith.constant 0 : index
      %c0_10 = arith.constant 0 : index
      %16 = vector.load %arg7[%c0_9, %c0_10] : memref<8x1xf32, #tpu.memory_space<vmem>>, vector<8x1xf32>
      %c0_11 = arith.constant 0 : index
      %c0_12 = arith.constant 0 : index
      %17 = vector.load %arg8[%c0_11, %c0_12] : memref<1x8xf32, #tpu.memory_space<vmem>>, vector<1x8xf32>
      %18 = vector.broadcast %16 : vector<8x1xf32> to vector<8x8xf32>
      %19 = vector.broadcast %17 : vector<1x8xf32> to vector<8x8xf32>
      %20 = arith.addf %18, %19 : vector<8x8xf32>
      %cst_13 = arith.constant 2.000000e+00 : f32
      %21 = vector.broadcast %cst_13 : f32 to vector<8x8xf32>
      %22 = arith.mulf %21, %15 : vector<8x8xf32>
      %23 = arith.subf %20, %22 : vector<8x8xf32>
      %cst_14 = arith.constant 0.000000e+00 : f32
      %24 = vector.broadcast %cst_14 : f32 to vector<8x8xf32>
      %25 = arith.maximumf %23, %24 : vector<8x8xf32>
      %c8_i32 = arith.constant 8 : i32
      %26 = arith.muli %arg0, %c8_i32 : i32
      %27 = tpu.iota {dimensions = array<i32: 0>} : vector<8x8xi32>
      %28 = vector.broadcast %26 : i32 to vector<8x8xi32>
      %29 = arith.addi %28, %27 : vector<8x8xi32>
      %c8_i32_15 = arith.constant 8 : i32
      %30 = arith.muli %arg1, %c8_i32_15 : i32
      %31 = tpu.iota {dimensions = array<i32: 1>} : vector<8x8xi32>
      %32 = vector.broadcast %30 : i32 to vector<8x8xi32>
      %33 = arith.addi %32, %31 : vector<8x8xi32>
      %34 = arith.cmpi eq, %29, %33 : vector<8x8xi32>
      %cst_16 = arith.constant 0.000000e+00 : f32
      %35 = vector.broadcast %cst_16 : f32 to vector<8x8xf32>
      %36 = arith.select %34, %35, %25 : vector<8x8xi1>, vector<8x8xf32>
      %c0_17 = arith.constant 0 : index
      %c0_18 = arith.constant 0 : index
      %37 = vector.load %arg5[%c0_17, %c0_18] : memref<8x1xi32, #tpu.memory_space<vmem>>, vector<8x1xi32>
      %c0_19 = arith.constant 0 : index
      %c0_20 = arith.constant 0 : index
      %38 = vector.load %arg6[%c0_19, %c0_20] : memref<1x8xi32, #tpu.memory_space<vmem>>, vector<1x8xi32>
      %c0_i32_21 = arith.constant 0 : i32
      %39 = vector.broadcast %c0_i32_21 : i32 to vector<8x1xi32>
      %40 = arith.cmpi sge, %37, %39 : vector<8x1xi32>
      %c0_i32_22 = arith.constant 0 : i32
      %41 = vector.broadcast %c0_i32_22 : i32 to vector<1x8xi32>
      %42 = arith.cmpi sge, %38, %41 : vector<1x8xi32>
      %43 = vector.broadcast %40 : vector<8x1xi1> to vector<8x8xi1>
      %44 = vector.broadcast %42 : vector<1x8xi1> to vector<8x8xi1>
      %45 = arith.andi %43, %44 : vector<8x8xi1>
      %46 = vector.broadcast %37 : vector<8x1xi32> to vector<8x8xi32>
      %47 = vector.broadcast %38 : vector<1x8xi32> to vector<8x8xi32>
      %48 = arith.cmpi eq, %46, %47 : vector<8x8xi32>
      %49 = arith.andi %48, %45 : vector<8x8xi1>
      %50 = vector.broadcast %37 : vector<8x1xi32> to vector<8x8xi32>
      %51 = vector.broadcast %38 : vector<1x8xi32> to vector<8x8xi32>
      %52 = arith.cmpi ne, %50, %51 : vector<8x8xi32>
      %53 = arith.andi %52, %45 : vector<8x8xi1>
      %c0_23 = arith.constant 0 : index
      %54 = memref.load %arg2[%c0_23] : memref<1xf32, #tpu.memory_space<smem>>
      %55 = vector.broadcast %54 : f32 to vector<8x8xf32>
      %56 = arith.subf %55, %36 : vector<8x8xf32>
      %cst_24 = arith.constant 0.000000e+00 : f32
      %57 = vector.broadcast %cst_24 : f32 to vector<8x8xf32>
      %58 = arith.maximumf %56, %57 : vector<8x8xf32>
      %59 = arith.cmpi sgt, %arg1, %arg0 : i32
      %cst_25 = arith.constant 2.000000e+00 : f32
      %cst_26 = arith.constant 1.000000e+00 : f32
      %60 = arith.select %59, %cst_25, %cst_26 : f32
      %c0_27 = arith.constant 0 : index
      %c0_28 = arith.constant 0 : index
      %61 = vector.load %arg11[%c0_27, %c0_28] : memref<8x8xf32, #tpu.memory_space<vmem>>, vector<8x8xf32>
      %cst_29 = arith.constant 0.000000e+00 : f32
      %62 = vector.broadcast %cst_29 : f32 to vector<8x8xf32>
      %63 = arith.select %49, %36, %62 : vector<8x8xi1>, vector<8x8xf32>
      %64 = vector.broadcast %60 : f32 to vector<8x8xf32>
      %65 = arith.mulf %64, %63 : vector<8x8xf32>
      %66 = arith.addf %61, %65 : vector<8x8xf32>
      %c0_30 = arith.constant 0 : index
      %c0_31 = arith.constant 0 : index
      %67 = vector.load %arg11[%c0_30, %c0_31] : memref<8x8xf32, #tpu.memory_space<vmem>>, vector<8x8xf32>
      tpu.vector_store %arg11[%c0_30, %c0_31], %66 {strides = array<i32>} : memref<8x8xf32, #tpu.memory_space<vmem>>, vector<8x8xf32>,
      %c0_32 = arith.constant 0 : index
      %c0_33 = arith.constant 0 : index
      %68 = vector.load %arg12[%c0_32, %c0_33] : memref<8x8xf32, #tpu.memory_space<vmem>>, vector<8x8xf32>
      %cst_34 = arith.constant 0.000000e+00 : f32
      %69 = vector.broadcast %cst_34 : f32 to vector<8x8xf32>
      %70 = arith.select %53, %58, %69 : vector<8x8xi1>, vector<8x8xf32>
      %71 = vector.broadcast %60 : f32 to vector<8x8xf32>
      %72 = arith.mulf %71, %70 : vector<8x8xf32>
      %73 = arith.addf %68, %72 : vector<8x8xf32>
      %c0_35 = arith.constant 0 : index
      %c0_36 = arith.constant 0 : index
      %74 = vector.load %arg12[%c0_35, %c0_36] : memref<8x8xf32, #tpu.memory_space<vmem>>, vector<8x8xf32>
      tpu.vector_store %arg12[%c0_35, %c0_36], %73 {strides = array<i32>} : memref<8x8xf32, #tpu.memory_space<vmem>>, vector<8x8xf32>,
    } else {
    }
    %c0_i32_3 = arith.constant 0 : i32
    %8 = arith.cmpi eq, %arg0, %c0_i32_3 : i32
    %c0_i32_4 = arith.constant 0 : i32
    %9 = arith.cmpi eq, %arg1, %c0_i32_4 : i32
    %10 = arith.andi %8, %9 : i1
    %11 = arith.extui %10 : i1 to i32
    %c0_i32_5 = arith.constant 0 : i32
    %12 = arith.cmpi ne, %11, %c0_i32_5 : i32
    scf.if %12 {
      %c0 = arith.constant 0 : index
      %c0_6 = arith.constant 0 : index
      %13 = vector.load %arg11[%c0, %c0_6] : memref<8x8xf32, #tpu.memory_space<vmem>>, vector<8x8xf32>
      %14 = vector.shape_cast %13 : vector<8x8xf32> to vector<1x8x8xf32>
      %cst = arith.constant dense<0.000000e+00> : vector<1xf32>
      %15 = vector.multi_reduction <add>, %14, %cst [1, 2] : vector<1x8x8xf32> to vector<1xf32>
      %16 = vector.shape_cast %15 : vector<1xf32> to vector<1x1x1xf32>
      %17 = vector.extract %16[0, 0, 0] : f32 from vector<1x1x1xf32>
      %18 = vector.broadcast %17 : f32 to vector<1x1xf32>
      %c0_7 = arith.constant 0 : index
      %c0_8 = arith.constant 0 : index
      %19 = vector.load %arg9[%c0_7, %c0_8] : memref<1x1xf32, #tpu.memory_space<vmem>>, vector<1x1xf32>
      tpu.vector_store %arg9[%c0_7, %c0_8], %18 {strides = array<i32>} : memref<1x1xf32, #tpu.memory_space<vmem>>, vector<1x1xf32>,
      %c0_9 = arith.constant 0 : index
      %c0_10 = arith.constant 0 : index
      %20 = vector.load %arg12[%c0_9, %c0_10] : memref<8x8xf32, #tpu.memory_space<vmem>>, vector<8x8xf32>
      %21 = vector.shape_cast %20 : vector<8x8xf32> to vector<1x8x8xf32>
      %cst_11 = arith.constant dense<0.000000e+00> : vector<1xf32>
      %22 = vector.multi_reduction <add>, %21, %cst_11 [1, 2] : vector<1x8x8xf32> to vector<1xf32>
      %23 = vector.shape_cast %22 : vector<1xf32> to vector<1x1x1xf32>
      %24 = vector.extract %23[0, 0, 0] : f32 from vector<1x1x1xf32>
      %25 = vector.broadcast %24 : f32 to vector<1x1xf32>
      %c0_12 = arith.constant 0 : index
      %c0_13 = arith.constant 0 : index
      %26 = vector.load %arg10[%c0_12, %c0_13] : memref<1x1xf32, #tpu.memory_space<vmem>>, vector<1x1xf32>
      tpu.vector_store %arg10[%c0_12, %c0_13], %25 {strides = array<i32>} : memref<1x1xf32, #tpu.memory_space<vmem>>, vector<1x1xf32>,
    } else {
    }
    return
  }
  func.func @transform_0(%arg0: i32, %arg1: i32) -> i32 {
    %c0_i32 = arith.constant 0 : i32
    %c0_i32_0 = arith.constant 0 : i32
    return %c0_i32 : i32
  }
  func.func @transform_1(%arg0: i32, %arg1: i32) -> (i32, i32) {
    %c0_i32 = arith.constant 0 : i32
    %c0_i32_0 = arith.constant 0 : i32
    return %arg0, %c0_i32 : i32, i32
  }
  func.func @transform_2(%arg0: i32, %arg1: i32) -> (i32, i32) {
    %c0_i32 = arith.constant 0 : i32
    %c0_i32_0 = arith.constant 0 : i32
    return %arg1, %c0_i32 : i32, i32
  }
  func.func @transform_3(%arg0: i32, %arg1: i32) -> (i32, i32) {
    %c0_i32 = arith.constant 0 : i32
    %c0_i32_0 = arith.constant 0 : i32
    return %arg0, %c0_i32 : i32, i32
  }
  func.func @transform_4(%arg0: i32, %arg1: i32) -> (i32, i32) {
    %c0_i32 = arith.constant 0 : i32
    %c0_i32_0 = arith.constant 0 : i32
    return %c0_i32, %arg1 : i32, i32
  }
  func.func @transform_5(%arg0: i32, %arg1: i32) -> (i32, i32) {
    %c0_i32 = arith.constant 0 : i32
    %c0_i32_0 = arith.constant 0 : i32
    return %arg0, %c0_i32 : i32, i32
  }
  func.func @transform_6(%arg0: i32, %arg1: i32) -> (i32, i32) {
    %c0_i32 = arith.constant 0 : i32
    %c0_i32_0 = arith.constant 0 : i32
    return %c0_i32, %arg1 : i32, i32
  }
  func.func @transform_7(%arg0: i32, %arg1: i32) -> (i32, i32) {
    %c0_i32 = arith.constant 0 : i32
    %c0_i32_0 = arith.constant 0 : i32
    %c0_i32_1 = arith.constant 0 : i32
    return %c0_i32, %c0_i32_0 : i32, i32
  }
  func.func @transform_8(%arg0: i32, %arg1: i32) -> (i32, i32) {
    %c0_i32 = arith.constant 0 : i32
    %c0_i32_0 = arith.constant 0 : i32
    %c0_i32_1 = arith.constant 0 : i32
    return %c0_i32, %c0_i32_0 : i32, i32
  }
}

</mosaic_0001>

<bundles_post_ra>
// kernel: tpu_custom_call.1
= control target key start
LH: loop header
LB: loop body
LE: loop exit
PB: predicated region body
PF: predicated region fallthrough
CT: control target
= control target key end

     0   :  { %15 = vsyncpa [#allocation6], 0  ;;  %vm37_vm0 = vcmask 64512   ;;  %vm46_vm1 = vcmask 261120   ;;  %v320_v1 = vmov 0.0   ;;  %vm321_vm2 = vmmov 0   ;;  %s407_s0 = inlined_call_operand.<no memory space> [shape: f32[1], index: 0, kind: input, shape index: {}]   ;;  %s408_s1 = inlined_call_operand.vmem [shape: f32[8,32], index: 1, kind: input, shape index: {}]   ;;  %s409_s2 = inlined_call_operand.vmem [shape: f32[8,32], index: 2, kind: input, shape index: {}]   ;;  %s410_s3 = inlined_call_operand.vmem [shape: s32[8,1], index: 3, kind: input, shape index: {}]   ;;  %s411_s4 = inlined_call_operand.vmem [shape: s32[1,8], index: 4, kind: input, shape index: {}]   ;;  %s412_s5 = inlined_call_operand.vmem [shape: f32[8,1], index: 5, kind: input, shape index: {}]   ;;  %s413_s6 = inlined_call_operand.vmem [shape: f32[1,8], index: 6, kind: input, shape index: {}]   ;;  %s414_s7 = inlined_call_operand.hbm [shape: f32[1,1], index: 7, kind: output, shape index: {0}]   ;;  %s415_s8 = inlined_call_operand.hbm [shape: f32[1,1], index: 8, kind: output, shape index: {1}]  }
   0x1   :  { %v45_v0 = vld [vmem:[%s409_s2] sm:$0xff]  ;;  %38 = vst.msk [vmem:[#allocation2] sm:$0xff] %vm37_vm0, %v320_v1  ;;  %39 = vst.msk [vmem:[#allocation3] sm:$0xff] %vm37_vm0, %v320_v1  ;;  %260 = vmatprep.subr.mxu0 %v320_v1  ;;  %262 = vmatprep.mubr.msk.f32.mxu0 %vm321_vm2, %v320_v1  ;;  %v322_v5 = vmov 0  }
   0x2   :  { %v123_v2 = vld [vmem:[%s412_s5] sm:$0xff]  ;;  %261 = vmatpush3.xpose.msk.msra.mxu0 %vm46_vm1, %v45_v0  ;;  %274 = vset.pattern.permute.xlu0 %v322_v5 }
   0x3   :  { %v152_v3 = vld [vmem:[%s410_s3] sm:$0xff] }
   0x4   :  { %v44_v4 = vld [vmem:[%s408_s1] sm:$0xff]  ;;  %vm154_vm3 = vcmp.ge.s32.totalorder %v152_v3, 0 }
   0x5   :  { %16 = vsyncpa [#allocation8], 0  ;;  %127 = vperm.xlu0 %274, %v123_v2   ;;  %275 = vset.pattern.permute.xlu1 %v322_v5  ;;  %v156_v6 = vsel %vm154_vm3, 1, %v322_v5  ;;  %v141_v7 = vlaneseq  ;;  %v153_v8 = vld [vmem:[%s411_s4] sm:$0x1]  ;;  %v180_v25 = vstv %s407_s0  ;;  %s323_s0 = smov [#allocation5]  }
   0x6   :  { %169 = vperm.xlu1 %275, %v152_v3   ;;  %263 = vmatmul.mubr.msk.f32.vlgmr.msra.gmra.mxu0 %vm46_vm1, %v44_v4  ;;  %vm155_vm4 = vcmp.ge.s32.totalorder %v153_v8, 0  ;;  %v257_v13 = vld [vmem:[%s413_s6] ss:$0 sm:$0xff]  ;;  %s233_s6 = sshll.u32 %s323_s0, 4  ;;  %vm212_vm13 = vcmask 0   ;;  %s324_s15 = smov [#allocation7]   ;;  %s234_s6 = int_to_ptr.vmem [resolvable:$true] %s233_s6 }
   0x7   :  { %v142_v9 = vshrl.u32 %v141_v7, 7  ;;  %v161_v12 = vsel %vm155_vm4, 1, %v322_v5  ;;  %v147_v18 = vand.u32 127, %v141_v7  ;;  %s243_s16 = sshll.u32 %s324_s15, 4  ;;  %s276_s17 = scalar_lea.vmem %s234_s6, 16  ;;  %s244_s16 = int_to_ptr.vmem [resolvable:$true] %s243_s16 }
   0x8   :  { %v185_v26 = vld [vmem:[#allocation2] sm:$0xff]  ;;  %v192_v32 = vld [vmem:[#allocation3] sm:$0xff]  ;;  %p277_p0 = scmp.ne.s32.totalorder %s234_s6, %s276_s17  ;;  %s280_s18 = scalar_lea.vmem %s234_s6, 32 }
   0x9   :  { %158 = vperm.xlu0 %274, %v156_v6   ;;  %v164_v11 = vsub.s32 0, %v142_v9  ;;  %vm150_vm8 = vcmp.eq.s32.totalorder %v142_v9, %v147_v18  ;;  %p281_p1 = scmp.lt.s32.totalorder %s234_s6, %s234_s6  ;;  %p282_p2 = scmp.lt.s32.totalorder %s280_s18, %s276_s17 }
   0xb   :  { %v165_v14 = vrot.slane %v161_v12, %v164_v11  ;;  %v174_v19 = vrot.slane %v153_v8, %v164_v11  ;;  %p283_p3 = por %p282_p2, %p281_p1 }
   0xd   :  { %vm166_vm5 = vcmp.eq.s32.totalorder %v165_v14, 1  ;;  %p284_p4 = pnand %p283_p3, %p277_p0 }
  0x80   :  { %v128_v10 = vpop.permute.xlu0 %127 }
  0x81   :  { %v136_v16 = vadd.f32 %v257_v13, %v128_v10  ;;  %v170_v21 = vpop.permute.xlu1 %169 }
  0x82   :  { %vm175_vm9 = vcmp.eq.s32.totalorder %v170_v21, %v174_v19  ;;  %vm177_vm11 = vcmp.ne.s32.totalorder %v170_v21, %v174_v19 }
  0x84   :  { %v159_v15 = vpop.permute.xlu0 %158 }
  0x85   :  { %vm160_vm6 = vcmp.eq.s32.totalorder %v159_v15, 1 }
  0x86   :  { %vm167_vm7 = vmand %vm160_vm6, %vm166_vm5 }
  0x87   :  { %vm176_vm10 = vmand %vm175_vm9, %vm167_vm7 }
  0x88   :  { %vm178_vm12 = vmand %vm177_vm11, %vm167_vm7 }
  0xc6   :  { %v119_v17 = vpop.f32.mrf.mxu0 }
  0xc7   :  { %v137_v20 = vmul.f32 2.0, %v119_v17 }
  0xc8   :  { %v264_v22 = vpop.f32.mrf.mxu0 }
  0xc9   :  { %v138_v23 = vsub.f32 %v136_v16, %v137_v20 }
  0xcb   :  { %v139_v24 = vmax.f32 %v138_v23, 0.0 }
  0xcd   :  { %v151_v27 = vsel %vm150_vm8, 0.0, %v139_v24 }
  0xce   :  { %v181_v28 = vsub.f32 %v180_v25, %v151_v27  ;;  %v186_v29 = vsel %vm176_vm10, %v151_v27, 0.0 }
  0xcf   :  { %v189_v30 = vadd.f32 %v186_v29, %v185_v26 }
  0xd0   :  { %v182_v31 = vmax.f32 %v181_v28, 0.0 }
  0xd1   :  { %191 = vst.msk [vmem:[#allocation2] sm:$0xff] %vm37_vm0, %v189_v30 }
  0xd2   :  { %v193_v33 = vsel %vm178_vm12, %v182_v31, 0.0 }
  0xd3   :  { %v195_v34 = vadd.f32 %v193_v33, %v192_v32 }
  0xd5   :  { %196 = vst.msk [vmem:[#allocation3] sm:$0xff] %vm37_vm0, %v195_v34 }
  0xd8   :  { %v199_v35 = vld [vmem:[#allocation2] sm:$0xff] }
  0xd9   :  { %v201_v36 = vsel %vm37_vm0, %v199_v35, 0.0 }
  0xda   :  { %202 = vadd.xlane.f32.xlu1 %v201_v36 }
  0xdc   :  { %v214_v37 = vld [vmem:[#allocation3] sm:$0xff] }
  0xdd   :  { %v215_v38 = vsel %vm37_vm0, %v214_v37, 0.0 }
  0xde   :  { %216 = vadd.xlane.f32.xlu0 %v215_v38 }
 0x163   :  { %v203_v39 = vpop.xlane.xlu1 %202 }
 0x164   :  { %v204_v40 = vrot.slane %v203_v39, 4 }
 0x166   :  { %v205_v41 = vadd.f32 %v204_v40, %v203_v39 }
 0x167   :  { %v217_v42 = vpop.xlane.xlu0 %216 }
 0x168   :  { %v206_v43 = vrot.slane %v205_v41, 2  ;;  %v218_v44 = vrot.slane %v217_v42, 4 }
 0x16a   :  { %v219_v45 = vadd.f32 %v218_v44, %v217_v42  ;;  %v207_v46 = vadd.f32 %v206_v43, %v205_v41 }
 0x16c   :  { %v220_v47 = vrot.slane %v219_v45, 2  ;;  %v208_v48 = vrot.slane %v207_v46, 1 }
 0x16e   :  { %v221_v49 = vadd.f32 %v220_v47, %v219_v45  ;;  %v209_v50 = vadd.f32 %v208_v48, %v207_v46 }
 0x170   :  { %265 = vpush %v209_v50  ;;  %v222_v51 = vrot.slane %v221_v49, 1 }
 0x172   :  { %v223_v52 = vadd.f32 %v222_v51, %v221_v49 }
 0x174   :  { %267 = vpush %v223_v52 }
 0x1a1   :  { %s266_s14 = spop %265 }
 0x1a2   :  { %v211_v53 = vstv %s266_s14 }
 0x1a3   :  { %213 = vst.msk [vmem:[#allocation5] sm:$0x1] %vm212_vm13, %v211_v53 }
 0x1a4   :  { %287 = shalt.err (!%p284_p4)
}
 0x1a5   :  { %236 = dma.vmem_to_hbm [thread:$0]  %s234_s6, 16, %s414_s7, [#allocation6]  }
 0x1a6   :  { %s268_s21 = spop %267  ;;  %s296_s22 = scalar_lea.vmem %s244_s16, 16 }
 0x1a7   :  { %v225_v54 = vstv %s268_s21  ;;  %p297_p5 = scmp.ne.s32.totalorder %s244_s16, %s296_s22  ;;  %s300_s23 = scalar_lea.vmem %s244_s16, 32 }
 0x1a8   :  { %226 = vst.msk [vmem:[#allocation7] sm:$0x1] %vm212_vm13, %v225_v54  ;;  %p301_p6 = scmp.lt.s32.totalorder %s244_s16, %s244_s16  ;;  %p302_p7 = scmp.lt.s32.totalorder %s300_s23, %s296_s22 }
 0x1aa   :  { %p303_p8 = por %p302_p7, %p301_p6 }
 0x1ac   :  { %p304_p9 = pnand %p303_p8, %p297_p5 }
 0x1ae   :  { %307 = shalt.err (!%p304_p9)
}
 0x1af   :  { %246 = dma.vmem_to_hbm [thread:$0]  %s244_s16, 16, %s415_s8, [#allocation8]  }
 0x1b0   :  { %316 = dma.done.wait [#allocation6], 16  }
 0x1b1   :  { %317 = vsyncadd [#allocation6], 4294967280 }
 0x1b2   :  { %318 = dma.done.wait [#allocation8], 16  }
 0x1b3   :  { %319 = vsyncadd [#allocation8], 4294967280 }
 0x1b4   :  { %253 = vsyncpa [#allocation6], 1 }
 0x1b5   :  { %254 = vsyncpa [#allocation8], 1 }

</bundles_post_ra>
